<compile_context>
chip_gen: v7x
topology: tpu7x:2x2x1
jax: 0.10.0
libtpu: 0.0.40
codegen_flags: <defaults>
</compile_context>

<pallas_src>
import functools

import jax
import jax.numpy as jnp
from jax import lax
from jax.experimental import pallas as pl
from jax.experimental.pallas import tpu as pltpu

SIMPLEX_DIM = 8          # fixed group size (SimplexNorm.dim in the PyTorch module)
_LANES = 128             # lane width of the 2-D slab: groups of 8 never cross a vreg
_MIN_GRID_STEPS = 4      # keep the pipeline + both v7x TCs busy on medium inputs


def _round_up(a, b):
    return -(-a // b) * b


def _device_config():
    """Per-generation tile size / VMEM budget / bf16-max choice."""
    kind = ""
    try:
        kind = jax.devices()[0].device_kind.lower()
    except Exception:
        pass
    if "v7" in kind or "7x" in kind:
        # 64 MiB VMEM per TC, XLU-bound: keep 1 MiB blocks, spend effort on rolls.
        return dict(rows_per_tile=2048, vmem_limit=32 * 1024 * 1024, bf16_max=True)
    if "v6" in kind:
        return dict(rows_per_tile=4096, vmem_limit=64 * 1024 * 1024, bf16_max=True)
    if "v5" in kind:
        # HBM-bound; no bf16 VALU -> keep f32 butterfly, grow blocks.
        return dict(rows_per_tile=4096, vmem_limit=64 * 1024 * 1024, bf16_max=False)
    # Unknown backend (older TPU / interpret): conservative settings, f32 math.
    return dict(rows_per_tile=2048, vmem_limit=32 * 1024 * 1024, bf16_max=False)


def _simplex_norm_kernel(x_ref, o_ref, *, use_bf16_max):
    x = x_ref[...]                                   # (tm, 128)
    xf = x.astype(jnp.float32)
    W = x.shape[-1]

    # One (1, W) lane-index row.  Per butterfly stage we roll *this row only*
    # (one tiny vreg op) and compare it against lane ^ s: wherever the +s roll
    # delivers the XOR partner we take it, otherwise we take the -s roll.  This
    # is correct for either roll direction convention, and the XOR partner of a
    # lane never wraps (groups of 8 are 8-aligned), so the cyclic wrap of the
    # roll is never selected.
    lane = lax.broadcasted_iota(jnp.int32, (1, W), 1)
    stages = []
    for s in (1, 2, 4):
        src_fwd = pltpu.roll(lane, s, axis=1)        # lane index delivered by roll(+s)
        stages.append((s, src_fwd == (lane ^ s)))    # (1, W) bool, broadcasts in where

    def group_allreduce(v, op):
        # 3-stage XOR butterfly over aligned groups of 8 lanes: after stages
        # 1, 2, 4 every lane holds op-reduce over its own group, each element
        # contributing exactly once (exact for sums too).
        acc = v
        for s, take_fwd in stages:
            fwd = pltpu.roll(acc, s, axis=1)
            bwd = pltpu.roll(acc, W - s, axis=1)
            acc = op(acc, jnp.where(take_fwd, fwd, bwd))
        return acc

    if use_bf16_max:
        # bf16 max halves the XLU traffic of the 3 max stages.  Softmax is
        # exactly invariant to any per-group-uniform constant, so precision of
        # the max does not change results; nudging it up by ~one bf16 ulp
        # guarantees x - gmax <= 0 so exp cannot overflow.
        gmax = group_allreduce(x.astype(jnp.bfloat16), jnp.maximum).astype(jnp.float32)
        gmax = gmax + jnp.abs(gmax) * jnp.float32(2.0 ** -7)
    else:
        gmax = group_allreduce(xf, jnp.maximum)      # per-GROUP max (stability)

    e = jnp.exp(xf - gmax)                           # EUP
    gsum = group_allreduce(e, jnp.add)               # per-group sum, already broadcast
    o_ref[...] = (e * pl.reciprocal(gsum, approx=False)).astype(o_ref.dtype)


def _pick_row_tile(rows, rows_per_tile):
    if rows >= rows_per_tile:
        return rows_per_tile
    if rows <= 8:
        return rows                                   # single block == whole (tiny) array
    tm = max(8, _round_up(-(-rows // _MIN_GRID_STEPS), 8))
    return min(tm, _round_up(rows, 8))


def _run_slab(x2d, out_dtype, cfg):
    rows, W = x2d.shape
    tm = _pick_row_tile(rows, cfg["rows_per_tile"])
    kernel = functools.partial(_simplex_norm_kernel, use_bf16_max=cfg["bf16_max"])
    return pl.pallas_call(
        kernel,
        out_shape=jax.ShapeDtypeStruct((rows, W), out_dtype),
        grid_spec=pltpu.PrefetchScalarGridSpec(
            num_scalar_prefetch=0,
            grid=(pl.cdiv(rows, tm),),
            in_specs=[pl.BlockSpec((tm, W), lambda i: (i, 0))],
            out_specs=pl.BlockSpec((tm, W), lambda i: (i, 0)),
        ),
        compiler_params=pltpu.CompilerParams(
            dimension_semantics=("parallel",),        # shards rows across TCs on v7x
            vmem_limit_bytes=cfg["vmem_limit"],
        ),
    )(x2d)


def simplex_norm(x):
    """Pallas SimplexNorm: softmax over contiguous groups of 8 along the last axis."""
    shp = x.shape
    H = shp[-1]
    if H % SIMPLEX_DIM != 0:
        raise ValueError(f"last dim ({H}) must be divisible by {SIMPLEX_DIM}")
    n = x.size
    if n == 0:
        return x

    cfg = _device_config()
    W = _LANES
    flat = x.reshape(-1)                              # groups of 8 stay contiguous & aligned
    rows = n // W
    rem = n - rows * W                                # < 128, multiple of 8

    pieces = []
    if rows:
        # Contiguous prefix reshape: a bitcast, no padding, no extra HBM pass.
        main = flat.reshape(rows, W) if rem == 0 else flat[: rows * W].reshape(rows, W)
        pieces.append(_run_slab(main, x.dtype, cfg).reshape(-1))
    if rem:
        # Ragged tail shorter than one 128-lane row (< 16 groups): run the same
        # kernel on one tiny padded (8, 128) block; padded lanes produce finite
        # values that are sliced off.  Only this rare path pays a concatenate.
        tail = jnp.pad(flat[rows * W:], (0, 8 * W - rem)).reshape(8, W)
        pieces.append(_run_slab(tail, x.dtype, cfg).reshape(-1)[:rem])

    out = pieces[0] if len(pieces) == 1 else jnp.concatenate(pieces)
    return out.reshape(shp)


def _reference(x):
    """Pure-JAX reference mirroring the PyTorch forward exactly."""
    shp = x.shape
    xg = x.reshape(*shp[:-1], -1, SIMPLEX_DIM)
    return jax.nn.softmax(xg, axis=-1).reshape(shp)


if __name__ == "__main__":
    key = jax.random.PRNGKey(0)

    # NCHW-like conv feature map, as the PyTorch module would see.
    x = jax.random.normal(key, (2, 4, 16, 16), dtype=jnp.float32)
    y = jax.block_until_ready(simplex_norm(x))
    assert y.shape == x.shape and y.dtype == x.dtype
    assert jnp.allclose(y, _reference(x), atol=1e-5, rtol=1e-5), "mismatch (small input)"

    # Larger input with a wide value spread: exercises the multi-step grid, the
    # partial boundary block, and the per-group max stabilization.
    x2 = 10.0 * jax.random.normal(jax.random.PRNGKey(1), (3, 640, 520), dtype=jnp.float32)
    y2 = jax.block_until_ready(simplex_norm(x2))
    assert jnp.allclose(y2, _reference(x2), atol=1e-5, rtol=1e-5), "mismatch (large input)"

    print("KERNEL_OK")
</pallas_src>

<mosaic_0001>
module attributes {stable_mosaic.version = 11 : i64} {
  func.func @_simplex_norm_kernel(%arg0: i32, %arg1: memref<8x128xf32, #tpu.memory_space<vmem>>, %arg2: memref<8x128xf32, #tpu.memory_space<vmem>>) attributes {dimension_semantics = [#tpu.dimension_semantics<parallel>], iteration_bounds = array<i64: 2>, scalar_prefetch = 0 : i64, scratch_operands = 0 : i64, tpu.core_type = #tpu.core_type<tc>, window_params = [{transform_indices = @transform_0, window_bounds = array<i64: 8, 128>}, {transform_indices = @transform_1, window_bounds = array<i64: 8, 128>}]} {
    %c0 = arith.constant 0 : index
    %c0_0 = arith.constant 0 : index
    %0 = vector.load %arg1[%c0, %c0_0] : memref<8x128xf32, #tpu.memory_space<vmem>>, vector<8x128xf32>
    %1 = tpu.iota {dimensions = array<i32: 1>} : vector<1x128xi32>
    %c1_i32 = arith.constant 1 : i32
    %2 = tpu.dynamic_rotate %1 by %c1_i32 dim 1 : vector<1x128xi32>, i32 -> vector<1x128xi32>
    %c1_i32_1 = arith.constant 1 : i32
    %3 = vector.broadcast %c1_i32_1 : i32 to vector<1x128xi32>
    %4 = arith.xori %1, %3 : vector<1x128xi32>
    %5 = arith.cmpi eq, %2, %4 : vector<1x128xi32>
    %c2_i32 = arith.constant 2 : i32
    %6 = tpu.dynamic_rotate %1 by %c2_i32 dim 1 : vector<1x128xi32>, i32 -> vector<1x128xi32>
    %c2_i32_2 = arith.constant 2 : i32
    %7 = vector.broadcast %c2_i32_2 : i32 to vector<1x128xi32>
    %8 = arith.xori %1, %7 : vector<1x128xi32>
    %9 = arith.cmpi eq, %6, %8 : vector<1x128xi32>
    %c4_i32 = arith.constant 4 : i32
    %10 = tpu.dynamic_rotate %1 by %c4_i32 dim 1 : vector<1x128xi32>, i32 -> vector<1x128xi32>
    %c4_i32_3 = arith.constant 4 : i32
    %11 = vector.broadcast %c4_i32_3 : i32 to vector<1x128xi32>
    %12 = arith.xori %1, %11 : vector<1x128xi32>
    %13 = arith.cmpi eq, %10, %12 : vector<1x128xi32>
    %c1_i32_4 = arith.constant 1 : i32
    %14 = tpu.dynamic_rotate %0 by %c1_i32_4 dim 1 : vector<8x128xf32>, i32 -> vector<8x128xf32>
    %c127_i32 = arith.constant 127 : i32
    %15 = tpu.dynamic_rotate %0 by %c127_i32 dim 1 : vector<8x128xf32>, i32 -> vector<8x128xf32>
    %16 = vector.shape_cast %5 : vector<1x128xi1> to vector<1x128xi1>
    %17 = vector.broadcast %16 : vector<1x128xi1> to vector<8x128xi1>
    %18 = arith.select %17, %14, %15 : vector<8x128xi1>, vector<8x128xf32>
    %19 = arith.maximumf %0, %18 : vector<8x128xf32>
    %c2_i32_5 = arith.constant 2 : i32
    %20 = tpu.dynamic_rotate %19 by %c2_i32_5 dim 1 : vector<8x128xf32>, i32 -> vector<8x128xf32>
    %c126_i32 = arith.constant 126 : i32
    %21 = tpu.dynamic_rotate %19 by %c126_i32 dim 1 : vector<8x128xf32>, i32 -> vector<8x128xf32>
    %22 = vector.shape_cast %9 : vector<1x128xi1> to vector<1x128xi1>
    %23 = vector.broadcast %22 : vector<1x128xi1> to vector<8x128xi1>
    %24 = arith.select %23, %20, %21 : vector<8x128xi1>, vector<8x128xf32>
    %25 = arith.maximumf %19, %24 : vector<8x128xf32>
    %c4_i32_6 = arith.constant 4 : i32
    %26 = tpu.dynamic_rotate %25 by %c4_i32_6 dim 1 : vector<8x128xf32>, i32 -> vector<8x128xf32>
    %c124_i32 = arith.constant 124 : i32
    %27 = tpu.dynamic_rotate %25 by %c124_i32 dim 1 : vector<8x128xf32>, i32 -> vector<8x128xf32>
    %28 = vector.shape_cast %13 : vector<1x128xi1> to vector<1x128xi1>
    %29 = vector.broadcast %28 : vector<1x128xi1> to vector<8x128xi1>
    %30 = arith.select %29, %26, %27 : vector<8x128xi1>, vector<8x128xf32>
    %31 = arith.maximumf %25, %30 : vector<8x128xf32>
    %32 = arith.subf %0, %31 : vector<8x128xf32>
    %33 = math.exp %32 : vector<8x128xf32>
    %c1_i32_7 = arith.constant 1 : i32
    %34 = tpu.dynamic_rotate %33 by %c1_i32_7 dim 1 : vector<8x128xf32>, i32 -> vector<8x128xf32>
    %c127_i32_8 = arith.constant 127 : i32
    %35 = tpu.dynamic_rotate %33 by %c127_i32_8 dim 1 : vector<8x128xf32>, i32 -> vector<8x128xf32>
    %36 = vector.shape_cast %5 : vector<1x128xi1> to vector<1x128xi1>
    %37 = vector.broadcast %36 : vector<1x128xi1> to vector<8x128xi1>
    %38 = arith.select %37, %34, %35 : vector<8x128xi1>, vector<8x128xf32>
    %39 = arith.addf %33, %38 : vector<8x128xf32>
    %c2_i32_9 = arith.constant 2 : i32
    %40 = tpu.dynamic_rotate %39 by %c2_i32_9 dim 1 : vector<8x128xf32>, i32 -> vector<8x128xf32>
    %c126_i32_10 = arith.constant 126 : i32
    %41 = tpu.dynamic_rotate %39 by %c126_i32_10 dim 1 : vector<8x128xf32>, i32 -> vector<8x128xf32>
    %42 = vector.shape_cast %9 : vector<1x128xi1> to vector<1x128xi1>
    %43 = vector.broadcast %42 : vector<1x128xi1> to vector<8x128xi1>
    %44 = arith.select %43, %40, %41 : vector<8x128xi1>, vector<8x128xf32>
    %45 = arith.addf %39, %44 : vector<8x128xf32>
    %c4_i32_11 = arith.constant 4 : i32
    %46 = tpu.dynamic_rotate %45 by %c4_i32_11 dim 1 : vector<8x128xf32>, i32 -> vector<8x128xf32>
    %c124_i32_12 = arith.constant 124 : i32
    %47 = tpu.dynamic_rotate %45 by %c124_i32_12 dim 1 : vector<8x128xf32>, i32 -> vector<8x128xf32>
    %48 = vector.shape_cast %13 : vector<1x128xi1> to vector<1x128xi1>
    %49 = vector.broadcast %48 : vector<1x128xi1> to vector<8x128xi1>
    %50 = arith.select %49, %46, %47 : vector<8x128xi1>, vector<8x128xf32>
    %51 = arith.addf %45, %50 : vector<8x128xf32>
    %52 = tpu.reciprocal %51 : vector<8x128xf32> -> vector<8x128xf32>
    %53 = arith.mulf %33, %52 : vector<8x128xf32>
    %c0_13 = arith.constant 0 : index
    %c0_14 = arith.constant 0 : index
    %54 = vector.load %arg2[%c0_13, %c0_14] : memref<8x128xf32, #tpu.memory_space<vmem>>, vector<8x128xf32>
    tpu.vector_store %arg2[%c0_13, %c0_14], %53 {strides = array<i32>} : memref<8x128xf32, #tpu.memory_space<vmem>>, vector<8x128xf32>,
    return
  }
  func.func @transform_0(%arg0: i32) -> (i32, i32) {
    %c0_i32 = arith.constant 0 : i32
    %c0_i32_0 = arith.constant 0 : i32
    return %arg0, %c0_i32 : i32, i32
  }
  func.func @transform_1(%arg0: i32) -> (i32, i32) {
    %c0_i32 = arith.constant 0 : i32
    %c0_i32_0 = arith.constant 0 : i32
    return %arg0, %c0_i32 : i32, i32
  }
}

</mosaic_0001>

<bundles_post_ra>
// kernel: tpu_custom_call.1
= control target key start
LH: loop header
LB: loop body
LE: loop exit
PB: predicated region body
PF: predicated region fallthrough
CT: control target
= control target key end

     0   :  { %6 = vsyncpa [#allocation3], 0  ;;  %s679_s0 = inlined_call_operand.hbm [shape: f32[16,128], index: 0, kind: input, shape index: {}]   ;;  %s680_s1 = inlined_call_operand.hbm [shape: f32[16,128], index: 1, kind: output, shape index: {}]  }
   0x1   :  { %8 = vsyncpa [#allocation3 + $0x1], 0 }
   0x2   :  { %9 = vsyncpa [#allocation4], 0 }
   0x3   :  { %11 = vsyncpa [#allocation4 + $0x1], 0  ;;  %s477_s6 = smov 0   ;;  %s479_s7 = smov 0  }
   0x4   :  { %s481_s8 = smov 0   ;;  %s483_s9 = smov 0  }
   0x5 LB: > { %s498_s10 = sadd.s32 4294967295, %s456_s9   ;;  %s291_s11 = sadd.s32 4294967294, %s456_s9   ;;  %s456_s9 = sphi %s483_s9, %s701_s9   ;;  %s452_s8 = sphi %s481_s8, %s700_s8   ;;  %s448_s7 = sphi %s479_s7, %s699_s7   ;;  %s444_s6 = sphi %s477_s6, %s698_s6  }
   0x6   : > { %s502_s12 = sadd.s32 1, %s456_s9   ;;  %s24_s13 = sadd.s32 1, %s452_s8 }
   0x7   : > { %s21_s14 = ssub.s32 %s456_s9, %s502_s12  ;;  %p31_p0 = scmp.ne.s32.totalorder %s452_s8, %s448_s7 }
   0x8   : > { %p22_p1 = scmp.eq.s32.totalorder %s21_s14, 0  ;;  %p32_p2 = scmp.eq.s32.totalorder %s456_s9, 0 }
   0x9   : > { %p37_p3 = scmp.ne.s32.totalorder %s448_s7, %s444_s6  ;;  %p38_p4 = scmp.eq.s32.totalorder %s498_s10, 0 }
   0xa   : > { %s514_s15 = scalar_select %p22_p1, %s452_s8, %s24_s13  }
   0xb   : > { %p516_p5 = por %p32_p2, %p31_p0  ;;  %p520_p6 = por %p38_p4, %p37_p3 }
   0xc   : > { %p61_p7 = scmp.eq.s32.totalorder %s498_s10, 1  ;;  %p67_p8 = scmp.eq.s32.totalorder %s291_s11, 1 }
   0xd   : > { %p315_p10 = scmp.lt.s32.totalorder %s456_s9, 2  ;;  %s87_s20 = sand.u32 1, %s452_s8  }
   0xe   : > { %p527_p11 = por %p61_p7, %p31_p0  ;;  %p531_p12 = por %p67_p8, %p37_p3 }
   0xf   : > { %s295_s21 = sshll.u32 %s456_s9, 7  ;;  %s294_s22 = sshll.u32 %s87_s20, 3 }
  0x10   : > { %s684_s18 = scalar_select %p527_p11, 1, 0 }
  0x11   : > { %s685_s19 = scalar_select %p531_p12, 1, 0 }
  0x12   : > { %s540_s25 = scalar_lea.hbm %s679_s0, %s295_s21  ;;  %s91_s26 = scalar_lea.vmem [#allocation2], %s294_s22 }
  0x13   : > { %s98_s27 = sshll.u32 %s91_s26, 4  ;;  %p544_p13 = pnand %p315_p10, %p516_p5  ;;  %s548_s27 = int_to_ptr.vmem [resolvable:$true] %s98_s27 }
  0x14   : > { %s88_s29 = scalar_lea.sflag [#allocation3], %s87_s20  ;;  %s360_s30 = scalar_lea.hbm %s540_s25, 128 }
  0x15   : > { %p361_p2 = scmp.ne.s32.totalorder %s540_s25, %s360_s30  ;;  %p362_p3 = pneg %p544_p13 }
  0x16   : > { %s365_s4 = scalar_lea.hbm %s679_s0, 256  ;;  %p366_p5 = scmp.lt.u32.totalorder %s540_s25, %s679_s0 }
  0x17   : > { %p363_p4 = pnand %p362_p3, %p361_p2  ;;  %p367_p8 = scmp.lt.u32.totalorder %s365_s4, %s360_s30 }
  0x18   : > { %p369_p9 = scmp.lt.u32.totalorder %s360_s30, %s540_s25 }
  0x19   : > { %p364_p7 = pneg %p363_p4  ;;  %p368_p10 = por %p367_p8, %p366_p5 }
  0x1b   : > { %p370_p0 = por %p369_p9, %p368_p10 }
  0x1d   : > { %p371_p1 = pnand %p370_p0, %p364_p7 }
  0x1f   : > { %374 = shalt.err (!%p371_p1)
}
  0x20   : > { %s375_s13 = scalar_lea.vmem %s548_s27, 128  ;;  %s458_s14 = smov [#allocation2]  }
  0x21   : > { %p376_p2 = scmp.ne.s32.totalorder %s548_s27, %s375_s13  ;;  %s380_s16 = sshll.u32 %s458_s14, 4  ;;  %s381_s16 = int_to_ptr.vmem [resolvable:$false] %s380_s16 }
  0x22   : > { %s382_s20 = scalar_lea.vmem %s381_s16, 256  ;;  %p383_p11 = scmp.lt.s32.totalorder %s548_s27, %s381_s16 }
  0x23   : > { %p378_p4 = pnand %p376_p2, %p362_p3  ;;  %p384_p5 = scmp.lt.s32.totalorder %s382_s20, %s375_s13 }
  0x25   : > { %p379_p12 = pneg %p378_p4  ;;  %p385_p8 = por %p384_p5, %p383_p11 }
  0x27   : > { %p386_p9 = pnand %p385_p8, %p379_p12 }
  0x29   : > { %389 = shalt.err (!%p386_p9)
}
  0x2a   : > { %310 = dma.hbm_to_vmem [thread:$0]  (!%p544_p13), %s540_s25, 128, %s548_s27, %s88_s29  }
  0x2b   : > { %p687_p0 = scmp.lt.s32.totalorder %s456_s9, 3  ;;  %p688_p1 = scmp.ge.s32.totalorder %s456_s9, 1 }
  0x2d   : > { %p104_p3 = pnand %p688_p1, %p687_p0 }
  0x2e   : > { %s582_s21 = sand.u32 (!%p104_p3), 1, %s448_s7  }
  0x2f   : > { %107 = sbr.rel (%p104_p3) target bundleno = 814 (0x32e), region = 24  ;;  %s297_s22 = sshll.u32 (!%p104_p3), %s582_s21, 3 }
  0x30   : > { %s110_s23 = scalar_lea.sflag (!%p104_p3), [#allocation3], %s582_s21  ;;  %s113_s24 = scalar_lea.vmem (!%p104_p3), [#allocation2], %s297_s22 }
  0x36   : > { %435 = dma.done.wait (%p520_p6), %s110_s23, 128  }
  0x37   : > { %437 = vsyncadd (%p520_p6), %s110_s23, 4294967168  ;;  %v133_v0 = vlaneseq  ;;  %s459_s25 = smov 1   ;;  %v132_v2 = vld [vmem:[%s113_s24] sm:$0xff]  ;;  %s460_s26 = smov 127   ;;  %v462_v7 = vmov 0  }
  0x38   : > { %149 = vrot.lane.b32.xlu1 %v132_v2, %s460_s26  ;;  %s461_s27 = smov 2   ;;  %s463_s17 = smov 126  }
  0x39   : > { %v134_v1 = vand.u32 127, %v133_v0  ;;  %v153_v3 = vshrl.u32 %v133_v0, 7  ;;  %s464_s28 = smov 4   ;;  %s465_s29 = smov 124  }
  0x3a   : > { %s300_s30 = sshll.u32 %s498_s10, 7  ;;  %s131_s2 = scalar_lea.vmem [#allocation5], %s297_s22 }
  0x3b   : > { %135 = vrot.lane.b32.xlu0 %v134_v1, %s459_s25  ;;  %v137_v4 = vxor.u32 1, %v134_v1  ;;  %v154_v5 = vsub.s32 0, %v153_v3  ;;  %v141_v15 = vxor.u32 2, %v134_v1  ;;  %v145_v24 = vxor.u32 4, %v134_v1  ;;  %s221_s3 = sshll.u32 %s131_s2, 4  ;;  %s635_s11 = scalar_lea.hbm %s680_s1, %s300_s30  ;;  %s637_s3 = int_to_ptr.vmem [resolvable:$true] %s221_s3 }
  0x3c   : > { %139 = vrot.lane.b32.xlu1 %v134_v1, %s461_s27  ;;  %s208_s13 = scalar_lea.sflag [#allocation4], %s582_s21  ;;  %s390_s14 = scalar_lea.vmem %s637_s3, 128 }
  0x3d   : > { %p391_p6 = scmp.ne.s32.totalorder %s637_s3, %s390_s14  ;;  %p695_p11 = scmp.ne.s32.totalorder %s684_s18, 0 }
  0x3e   : > { %s466_s10 = smov [#allocation5]  }
  0x3f   : > { %147 = vrot.lane.b32.xlu0 %v132_v2, %s459_s25  ;;  %p392_p12 = pnand %p391_p6, %p695_p11  ;;  %s394_s16 = sshll.u32 %s466_s10, 4  ;;  %s395_s16 = int_to_ptr.vmem [resolvable:$false] %s394_s16 }
  0x40   : > { %s396_s20 = scalar_lea.vmem %s395_s16, 256  ;;  %p397_p7 = scmp.lt.s32.totalorder %s637_s3, %s395_s16 }
  0x41   : > { %p393_p13 = pneg %p392_p12  ;;  %p398_p10 = scmp.lt.s32.totalorder %s396_s20, %s390_s14 }
  0x43   : > { %p399_p2 = por %p398_p10, %p397_p7 }
  0x45   : > { %p400_p4 = pnand %p399_p2, %p393_p13 }
  0xaa   : > { %v150_v10 = vpop.permute.xlu1 %149 }
  0xad   : > { %v136_v6 = vpop.permute.xlu0 %135 }
  0xae   : > { %vm138_vm0 = vcmp.eq.s32.totalorder %v136_v6, %v137_v4  ;;  %v140_v16 = vpop.permute.xlu1 %139 }
  0xaf   : > { %v151_v8 = vsel %vm138_vm0, 1, %v462_v7  ;;  %vm142_vm2 = vcmp.eq.s32.totalorder %v140_v16, %v141_v15 }
  0xb0   : > { %v155_v9 = vrot.slane %v151_v8, %v154_v5  ;;  %v163_v17 = vsel %vm142_vm2, 1, %v462_v7 }
  0xb1   : > { %v148_v11 = vpop.permute.xlu0 %147  ;;  %v167_v18 = vrot.slane %v163_v17, %v154_v5 }
  0xb2   : > { %vm596_vm1 = vcmp.eq.s32.totalorder %v155_v9, 1 }
  0xb3   : > { %v157_v13 = vsel %vm596_vm1, %v148_v11, %v150_v10  ;;  %vm605_vm3 = vcmp.eq.s32.totalorder %v167_v18, 1 }
  0xb4   : > { %v158_v14 = vmax.f32 %v132_v2, %v157_v13 }
  0xb6   : > { %161 = vrot.lane.b32.xlu1 %v158_v14, %s463_s17  ;;  %159 = vrot.lane.b32.xlu0 %v158_v14, %s461_s27 }
  0xba   : > { %143 = vrot.lane.b32.xlu0 %v134_v1, %s464_s28 }
 0x128   : > { %v162_v20 = vpop.permute.xlu1 %161  ;;  %v160_v21 = vpop.permute.xlu0 %159 }
 0x129   : > { %v169_v22 = vsel %vm605_vm3, %v160_v21, %v162_v20 }
 0x12a   : > { %v170_v23 = vmax.f32 %v158_v14, %v169_v22 }
 0x12c   : > { %173 = vrot.lane.b32.xlu0 %v170_v23, %s465_s29  ;;  %171 = vrot.lane.b32.xlu1 %v170_v23, %s464_s28  ;;  %v144_v25 = vpop.permute.xlu0 %143 }
 0x12d   : > { %vm146_vm4 = vcmp.eq.s32.totalorder %v144_v25, %v145_v24 }
 0x12e   : > { %v175_v26 = vsel %vm146_vm4, 1, %v462_v7 }
 0x12f   : > { %v179_v27 = vrot.slane %v175_v26, %v154_v5 }
 0x131   : > { %vm612_vm5 = vcmp.eq.s32.totalorder %v179_v27, 1 }
 0x19e   : > { %v172_v29 = vpop.permute.xlu1 %171  ;;  %v174_v30 = vpop.permute.xlu0 %173 }
 0x19f   : > { %v181_v31 = vsel %vm612_vm5, %v172_v29, %v174_v30 }
 0x1a0   : > { %v182_v32 = vmax.f32 %v170_v23, %v181_v31 }
 0x1a2   : > { %v183_v33 = vsub.f32 %v132_v2, %v182_v32 }
 0x1a4   : > { %v184_v34 = vmul.f32 1.442695, %v183_v33 }
 0x1a6   : > { %356 = vpow2.f32 %v184_v34 }
 0x1b0   : > { %v357_v35 = vpop.eup %356 }
 0x1b1   : > { %188 = vrot.lane.b32.xlu0 %v357_v35, %s460_s26  ;;  %186 = vrot.lane.b32.xlu1 %v357_v35, %s459_s25 }
 0x223   : > { %v189_v36 = vpop.permute.xlu0 %188  ;;  %v187_v37 = vpop.permute.xlu1 %186 }
 0x224   : > { %v190_v38 = vsel %vm596_vm1, %v187_v37, %v189_v36 }
 0x225   : > { %v191_v39 = vadd.f32 %v357_v35, %v190_v38 }
 0x227   : > { %194 = vrot.lane.b32.xlu0 %v191_v39, %s463_s17  ;;  %192 = vrot.lane.b32.xlu1 %v191_v39, %s461_s27 }
 0x299   : > { %v195_v40 = vpop.permute.xlu0 %194  ;;  %v193_v41 = vpop.permute.xlu1 %192 }
 0x29a   : > { %v196_v42 = vsel %vm605_vm3, %v193_v41, %v195_v40 }
 0x29b   : > { %v197_v43 = vadd.f32 %v196_v42, %v191_v39 }
 0x29d   : > { %200 = vrot.lane.b32.xlu0 %v197_v43, %s465_s29  ;;  %198 = vrot.lane.b32.xlu1 %v197_v43, %s464_s28 }
 0x30f   : > { %v201_v44 = vpop.permute.xlu0 %200  ;;  %v199_v45 = vpop.permute.xlu1 %198 }
 0x310   : > { %v202_v46 = vsel %vm612_vm5, %v199_v45, %v201_v44 }
 0x311   : > { %v203_v47 = vadd.f32 %v202_v46, %v197_v43 }
 0x313   : > { %358 = vrcp.f32 %v203_v47 }
 0x31d   : > { %v359_v48 = vpop.eup %358 }
 0x31e   : > { %v205_v49 = vmul.f32 %v359_v48, %v357_v35 }
 0x320   : > { %206 = vst [vmem:[%s131_s2] sm:$0xff] %v205_v49 }
 0x321   : > { %403 = shalt.err (!%p400_p4)
}
 0x322   : > { %s404_s21 = scalar_lea.hbm %s635_s11, 128  ;;  %s408_s24 = scalar_lea.hbm %s680_s1, 256 }
 0x323   : > { %p405_p5 = scmp.ne.s32.totalorder %s635_s11, %s404_s21  ;;  %p409_p0 = scmp.lt.u32.totalorder %s635_s11, %s680_s1 }
 0x324   : > { %p410_p1 = scmp.lt.u32.totalorder %s408_s24, %s404_s21  ;;  %p412_p6 = scmp.lt.u32.totalorder %s404_s21, %s635_s11 }
 0x325   : > { %p406_p8 = pnand %p405_p5, %p695_p11 }
 0x326   : > { %p411_p3 = por %p410_p1, %p409_p0 }
 0x327   : > { %p407_p9 = pneg %p406_p8 }
 0x328   : > { %p413_p12 = por %p412_p6, %p411_p3 }
 0x32a   : > { %p414_p13 = pnand %p413_p12, %p407_p9 }
 0x32c   : > { %417 = shalt.err (!%p414_p13)
}
 0x32d   : > { %305 = dma.vmem_to_hbm [thread:$0]  (%p695_p11), %s637_s3, 128, %s635_s11, %s208_s13  }
 0x32e PF: > { %s233_s27 = sand.u32 1, %s444_s6   ;;  %p696_p7 = scmp.ne.s32.totalorder %s685_s19, 0 }
 0x32f   : > { %p697_p10 = scmp.ge.s32.totalorder %s456_s9, 2  ;;  %s234_s17 = scalar_lea.sflag [#allocation4], %s233_s27 }
 0x331   : > { %p312_p2 = pnand %p697_p10, %p696_p7 }
 0x333   : > { %439 = dma.done.wait (!%p312_p2), %s234_s17, 128  }
 0x334   : > { %441 = vsyncadd (!%p312_p2), %s234_s17, 4294967168  ;;  %p14_p4 = scmp.ge.s32.totalorder %s502_s12, 4   ;;  %s698_s6 = smov %s448_s7 }
 0x335   : > { %s699_s7 = smov %s452_s8  ;;  %s700_s8 = smov %s514_s15 }
 0x336   : > { %s701_s9 = smov %s502_s12  ;;  %16 = sbr.rel (!%p14_p4) target bundleno = 5 (0x5), region = 69 }
 0x33d   :  { %239 = vsyncpa [#allocation3], 1 }
 0x33e   :  { %241 = vsyncpa [#allocation3 + $0x1], 1 }
 0x33f   :  { %242 = vsyncpa [#allocation4], 1 }
 0x340   :  { %244 = vsyncpa [#allocation4 + $0x1], 1 }

</bundles_post_ra>
